<compile_context>
chip_gen: v7x
topology: tpu7x:2x2x1
jax: 0.10.0
libtpu: 0.0.40
codegen_flags: <defaults>
</compile_context>

<pallas_src>
import jax
import jax.numpy as jnp
from jax.experimental import pallas as pl
from jax.experimental.pallas import tpu as pltpu

IN_DIM = 64      # master_controller input features
HID_DIM = 128    # master_controller output / fc input features
OUT_DIM = 784    # fc output features (28*28)
OUT_PAD = 896    # 7 * 128 -> lane-dense output slab


def _round_up(n, m):
    return ((n + m - 1) // m) * m


def _generator_kernel(x_ref, w_ref, b_ref, o_ref):
    # Fused (fc ∘ master_controller): single MXU matmul, bias + ReLU on VPU.
    y = jnp.dot(x_ref[...], w_ref[...], preferred_element_type=jnp.float32)
    o_ref[...] = jnp.maximum(y + b_ref[...], 0.0).astype(o_ref.dtype)


def fuse_params(w1, b1, w2, b2):
    """Fold the two affine layers into one, done ONCE outside the forward.

    Exact (up to f32 rounding) because there is no nonlinearity between
    master_controller and fc.  Output features are zero-padded 784 -> 896 so
    kernel stores are lane-dense.
    """
    hi = jax.lax.Precision.HIGHEST
    w = jnp.dot(w1, w2, precision=hi)          # [IN_DIM, OUT_DIM]
    b = jnp.dot(b1, w2, precision=hi) + b2     # [1, OUT_DIM]
    pad = OUT_PAD - OUT_DIM
    w = jnp.pad(w, ((0, 0), (0, pad)))         # [IN_DIM, OUT_PAD]
    b = jnp.pad(b, ((0, 0), (0, pad)))         # [1, OUT_PAD]
    return w, b


def generator_forward(x, w_fused, b_fused, *, tile_b=256):
    """x: [B, IN_DIM] f32 -> [B, OUT_DIM] f32 (relu(fc(master_controller(x))))."""
    B = x.shape[0]

    # Sublane-aligned batch tile; shrink for tiny batches, cap at `tile_b`.
    tile_b = min(tile_b, _round_up(B, 8))
    padded_b = _round_up(B, tile_b)
    if padded_b != B:
        x = jnp.pad(x, ((0, padded_b - B), (0, 0)))
    grid = (padded_b // tile_b,)

    flops = 2 * padded_b * IN_DIM * OUT_PAD
    bytes_accessed = 4 * (padded_b * IN_DIM        # x in
                          + IN_DIM * OUT_PAD       # fused weight
                          + OUT_PAD                # fused bias
                          + padded_b * OUT_PAD)    # output

    out = pl.pallas_call(
        _generator_kernel,
        out_shape=jax.ShapeDtypeStruct((padded_b, OUT_PAD), jnp.float32),
        grid=grid,
        in_specs=[
            pl.BlockSpec((tile_b, IN_DIM), lambda i: (i, 0)),
            pl.BlockSpec((IN_DIM, OUT_PAD), lambda i: (0, 0)),   # resident across grid
            pl.BlockSpec((1, OUT_PAD), lambda i: (0, 0)),        # resident across grid
        ],
        out_specs=pl.BlockSpec((tile_b, OUT_PAD), lambda i: (i, 0)),
        compiler_params=pltpu.CompilerParams(
            dimension_semantics=("parallel",),
        ),
        cost_estimate=pl.CostEstimate(
            flops=flops, transcendentals=0, bytes_accessed=bytes_accessed),
    )(x, w_fused, b_fused)

    # Strip batch + lane padding outside the kernel.
    return out[:B, :OUT_DIM]


def init_params(key):
    """Deterministic init mirroring torch.nn.Linear's U(-1/sqrt(fan_in), 1/sqrt(fan_in))."""
    k1, k2, k3, k4 = jax.random.split(key, 4)
    bound1 = 1.0 / jnp.sqrt(IN_DIM)
    bound2 = 1.0 / jnp.sqrt(HID_DIM)
    # Stored as [in, out] (transposed relative to torch's [out, in]).
    w1 = jax.random.uniform(k1, (IN_DIM, HID_DIM), jnp.float32, -bound1, bound1)
    b1 = jax.random.uniform(k2, (1, HID_DIM), jnp.float32, -bound1, bound1)
    w2 = jax.random.uniform(k3, (HID_DIM, OUT_DIM), jnp.float32, -bound2, bound2)
    b2 = jax.random.uniform(k4, (1, OUT_DIM), jnp.float32, -bound2, bound2)
    return w1, b1, w2, b2


if __name__ == "__main__":
    key = jax.random.PRNGKey(0)
    pkey, xkey, xkey2 = jax.random.split(key, 3)
    w1, b1, w2, b2 = init_params(pkey)

    # Fold the two linears once (weight preprocessing, not per-call work).
    w_fused, b_fused = fuse_params(w1, b1, w2, b2)

    hi = jax.lax.Precision.HIGHEST

    # --- case 1: tiny batch (single grid step) ---
    batch = 8
    x = jax.random.normal(xkey, (batch, IN_DIM), jnp.float32)
    out = generator_forward(x, w_fused, b_fused)
    out = jax.block_until_ready(out)
    assert out.shape == (batch, OUT_DIM)

    # Reference using the same fused params (tight tolerance).
    ref_fused = jnp.maximum(
        jnp.dot(x, w_fused[:, :OUT_DIM], precision=hi) + b_fused[:, :OUT_DIM], 0.0)
    assert jnp.allclose(out, ref_fused, atol=1e-4, rtol=1e-4)

    # Reference using the original two-linear formulation (rounding-level diff).
    ref_orig = jnp.maximum(
        jnp.dot(jnp.dot(x, w1, precision=hi) + b1, w2, precision=hi) + b2, 0.0)
    assert jnp.allclose(out, ref_orig, atol=1e-3, rtol=1e-3)

    # --- case 2: batch not a multiple of the tile, multi-step grid ---
    batch2 = 20
    x2 = jax.random.normal(xkey2, (batch2, IN_DIM), jnp.float32)
    out2 = generator_forward(x2, w_fused, b_fused, tile_b=8)   # grid=(3,), padded batch 24
    out2 = jax.block_until_ready(out2)
    assert out2.shape == (batch2, OUT_DIM)
    ref2 = jnp.maximum(
        jnp.dot(x2, w_fused[:, :OUT_DIM], precision=hi) + b_fused[:, :OUT_DIM], 0.0)
    assert jnp.allclose(out2, ref2, atol=1e-4, rtol=1e-4)

    print("KERNEL_OK")
</pallas_src>

<mosaic_0001>
module attributes {stable_mosaic.version = 11 : i64} {
  func.func @_generator_kernel(%arg0: i32, %arg1: memref<8x64xf32, #tpu.memory_space<vmem>>, %arg2: memref<64x896xf32, #tpu.memory_space<vmem>>, %arg3: memref<1x896xf32, #tpu.memory_space<vmem>>, %arg4: memref<8x896xf32, #tpu.memory_space<vmem>>) attributes {dimension_semantics = [#tpu.dimension_semantics<parallel>], iteration_bounds = array<i64: 1>, scalar_prefetch = 0 : i64, scratch_operands = 0 : i64, tpu.core_type = #tpu.core_type<tc>, window_params = [{transform_indices = @transform_0, window_bounds = array<i64: 8, 64>}, {pipeline_mode = #tpu.pipeline_mode<synchronous>, transform_indices = @transform_1, window_bounds = array<i64: 64, 896>}, {pipeline_mode = #tpu.pipeline_mode<synchronous>, transform_indices = @transform_2, window_bounds = array<i64: 1, 896>}, {transform_indices = @transform_3, window_bounds = array<i64: 8, 896>}]} {
    %c0 = arith.constant 0 : index
    %c0_0 = arith.constant 0 : index
    %0 = vector.load %arg1[%c0, %c0_0] : memref<8x64xf32, #tpu.memory_space<vmem>>, vector<8x64xf32>
    %c0_1 = arith.constant 0 : index
    %c0_2 = arith.constant 0 : index
    %1 = vector.load %arg2[%c0_1, %c0_2] : memref<64x896xf32, #tpu.memory_space<vmem>>, vector<64x896xf32>
    %cst = arith.constant dense<0.000000e+00> : vector<8x896xf32>
    %2 = tpu.matmul %0, %1, %cst {dimension_numbers = #tpu.dot_dimension_numbers<[1], [0], [0], [1], [0, 0, 1, 1], [], []>} : vector<8x64xf32>, vector<64x896xf32>, vector<8x896xf32> -> vector<8x896xf32>
    %c0_3 = arith.constant 0 : index
    %c0_4 = arith.constant 0 : index
    %3 = vector.load %arg3[%c0_3, %c0_4] : memref<1x896xf32, #tpu.memory_space<vmem>>, vector<1x896xf32>
    %4 = vector.broadcast %3 : vector<1x896xf32> to vector<8x896xf32>
    %5 = arith.addf %2, %4 : vector<8x896xf32>
    %cst_5 = arith.constant 0.000000e+00 : f32
    %6 = vector.broadcast %cst_5 : f32 to vector<8x896xf32>
    %7 = arith.maximumf %5, %6 : vector<8x896xf32>
    %c0_6 = arith.constant 0 : index
    %c0_7 = arith.constant 0 : index
    %8 = vector.load %arg4[%c0_6, %c0_7] : memref<8x896xf32, #tpu.memory_space<vmem>>, vector<8x896xf32>
    tpu.vector_store %arg4[%c0_6, %c0_7], %7 {strides = array<i32>} : memref<8x896xf32, #tpu.memory_space<vmem>>, vector<8x896xf32>,
    return
  }
  func.func @transform_0(%arg0: i32) -> (i32, i32) {
    %c0_i32 = arith.constant 0 : i32
    %c0_i32_0 = arith.constant 0 : i32
    return %arg0, %c0_i32 : i32, i32
  }
  func.func @transform_1(%arg0: i32) -> (i32, i32) {
    %c0_i32 = arith.constant 0 : i32
    %c0_i32_0 = arith.constant 0 : i32
    %c0_i32_1 = arith.constant 0 : i32
    return %c0_i32, %c0_i32_0 : i32, i32
  }
  func.func @transform_2(%arg0: i32) -> (i32, i32) {
    %c0_i32 = arith.constant 0 : i32
    %c0_i32_0 = arith.constant 0 : i32
    %c0_i32_1 = arith.constant 0 : i32
    return %c0_i32, %c0_i32_0 : i32, i32
  }
  func.func @transform_3(%arg0: i32) -> (i32, i32) {
    %c0_i32 = arith.constant 0 : i32
    %c0_i32_0 = arith.constant 0 : i32
    return %arg0, %c0_i32 : i32, i32
  }
}

</mosaic_0001>

<bundles_post_ra>
// kernel: tpu_custom_call.1
= control target key start
LH: loop header
LB: loop body
LE: loop exit
PB: predicated region body
PF: predicated region fallthrough
CT: control target
= control target key end

     0   :  { %8 = vsyncpa [#allocation3], 0  ;;  %s706_s0 = inlined_call_operand.hbm [shape: f32[8,64], index: 0, kind: input, shape index: {}]   ;;  %s707_s1 = inlined_call_operand.hbm [shape: f32[64,896], index: 1, kind: input, shape index: {}]   ;;  %s708_s2 = inlined_call_operand.vmem [shape: f32[1,896], index: 2, kind: input, shape index: {}]   ;;  %s709_s3 = inlined_call_operand.hbm [shape: f32[8,896], index: 3, kind: output, shape index: {}]  }
   0x1   :  { %9 = vsyncpa [#allocation6], 0 }
   0x2   :  { %10 = vsyncpa [#allocation4], 0  ;;  %s624_s12 = smov [#allocation2]   ;;  %s625_s14 = smov [#allocation5]  }
   0x3   :  { %s17_s13 = sshll.u32 %s624_s12, 4  ;;  %s26_s15 = sshll.u32 %s625_s14, 4  ;;  %s18_s13 = int_to_ptr.vmem [resolvable:$true] %s17_s13  ;;  %s652_s15 = int_to_ptr.vmem [resolvable:$true] %s26_s15 }
   0x4   :  { %s552_s18 = scalar_lea.hbm %s706_s0, 128 }
   0x5   :  { %p553_p0 = scmp.ne.s32.totalorder %s706_s0, %s552_s18  ;;  %p556_p1 = scmp.lt.u32.totalorder %s552_s18, %s706_s0 }
   0x7   :  { %p558_p2 = pnand %p556_p1, %p553_p0 }
   0x9   :  { %561 = shalt.err (!%p558_p2)
}
   0xa   :  { %s562_s23 = scalar_lea.vmem %s18_s13, 128  ;;  %p567_p4 = scmp.lt.s32.totalorder %s18_s13, %s18_s13 }
   0xb   :  { %p563_p3 = scmp.ne.s32.totalorder %s18_s13, %s562_s23  ;;  %p568_p5 = scmp.lt.s32.totalorder %s562_s23, %s562_s23 }
   0xd   :  { %p569_p6 = por %p568_p5, %p567_p4 }
   0xf   :  { %p570_p7 = pnand %p569_p6, %p563_p3 }
  0x11   :  { %573 = shalt.err (!%p570_p7)
}
  0x12   :  { %20 = dma.hbm_to_vmem [thread:$0]  %s706_s0, 128, %s18_s13, [#allocation3]  }
  0x13   :  { %s574_s28 = scalar_lea.hbm %s707_s1, 7168 }
  0x14   :  { %p575_p8 = scmp.ne.s32.totalorder %s707_s1, %s574_s28  ;;  %p578_p9 = scmp.lt.u32.totalorder %s574_s28, %s707_s1 }
  0x16   :  { %p580_p10 = pnand %p578_p9, %p575_p8 }
  0x18   :  { %583 = shalt.err (!%p580_p10)
}
  0x19   :  { %s584_s6 = scalar_lea.vmem %s652_s15, 7168  ;;  %p589_p12 = scmp.lt.s32.totalorder %s652_s15, %s652_s15 }
  0x1a   :  { %p585_p11 = scmp.ne.s32.totalorder %s652_s15, %s584_s6  ;;  %p590_p13 = scmp.lt.s32.totalorder %s584_s6, %s584_s6 }
  0x1c   :  { %p591_p0 = por %p590_p13, %p589_p12 }
  0x1e   :  { %p592_p1 = pnand %p591_p0, %p585_p11 }
  0x20   :  { %595 = shalt.err (!%p592_p1)
}
  0x21   :  { %s626_s0 = smov 896   ;;  %s627_s7 = smov 56  }
  0x22   :  { %32 = dma.hbm_to_vmem [thread:$0]  %s707_s1, 7168, %s652_s15, [#allocation6], %s626_s0, %s626_s0, %s627_s7  }
  0x23   :  { %618 = dma.done.wait [#allocation3], 128  }
  0x24   :  { %619 = vsyncadd [#allocation3], 4294967168 }
  0x25   :  { %620 = dma.done.wait [#allocation6], 7168  }
  0x26   :  { %621 = vsyncadd [#allocation6], 4294960128  ;;  %v628_v0 = vmov 0.0   ;;  %v43_v1 = vld [vmem:[#allocation5 + $0x8] sm:$0xff]  ;;  %v50_v2 = vld [vmem:[#allocation5 + $0x40] sm:$0xff]  ;;  %vm135_vm0 = vcmask 523264  }
  0x27   :  { %203 = vmatprep.mubr.f32.mxu0 %v628_v0  ;;  %274 = vmatprep.mubr.f32.mxu1 %v628_v0  ;;  %v45_v3 = vld [vmem:[#allocation5 + $0x18] sm:$0xff]  ;;  %v484_v4 = vpack.c.bf16 %v50_v2, %v43_v1  ;;  %v52_v5 = vld [vmem:[#allocation5 + $0x50] sm:$0xff]  ;;  %v42_v6 = vld [vmem:[#allocation5] sm:$0xff]  ;;  %v629_v2 = vmov 0.0|0.0   ;;  %vm630_vm1 = vmmov 0  }
  0x28   :  { %v49_v7 = vld [vmem:[#allocation5 + $0x38] sm:$0xff]  ;;  %v500_v8 = vpack.c.bf16 %v52_v5, %v45_v3  ;;  %v44_v10 = vld [vmem:[#allocation5 + $0x10] sm:$0xff]  ;;  %v51_v11 = vld [vmem:[#allocation5 + $0x48] sm:$0xff] }
  0x29   :  { %v486_v9 = vpack.c.bf16 %v49_v7, %v42_v6  ;;  %v57_v12 = vld [vmem:[#allocation5 + $0x78] sm:$0xff]  ;;  %485 = vmatprep.subr.bf16.mxu0 %v484_v4  ;;  %v502_v13 = vpack.c.bf16 %v51_v11, %v44_v10  ;;  %v64_v14 = vld [vmem:[#allocation5 + $0xb0] sm:$0xff]  ;;  %v59_v15 = vld [vmem:[#allocation5 + $0x88] sm:$0xff] }
  0x2a   :  { %v66_v16 = vld [vmem:[#allocation5 + $0xc0] sm:$0xff]  ;;  %501 = vmatprep.subr.bf16.mxu1 %v500_v8  ;;  %v488_v17 = vpack.c.bf16 %v64_v14, %v57_v12  ;;  %v56_v19 = vld [vmem:[#allocation5 + $0x70] sm:$0xff]  ;;  %v63_v20 = vld [vmem:[#allocation5 + $0xa8] sm:$0xff] }
  0x2b   :  { %487 = vmatpush1.bf16.msra.mxu0 %v486_v9  ;;  %v504_v18 = vpack.c.bf16 %v66_v16, %v59_v15  ;;  %v58_v21 = vld [vmem:[#allocation5 + $0x80] sm:$0xff]  ;;  %503 = vmatpush1.bf16.msra.mxu1 %v502_v13  ;;  %v490_v22 = vpack.c.bf16 %v63_v20, %v56_v19  ;;  %v65_v23 = vld [vmem:[#allocation5 + $0xb8] sm:$0xff]  ;;  %v71_v24 = vld [vmem:[#allocation5 + $0xe8] sm:$0xff] }
  0x2c   :  { %v78_v25 = vld [vmem:[#allocation5 + $0x120] sm:$0xff]  ;;  %489 = vmatprep.subr.bf16.mxu0 %v488_v17  ;;  %v506_v26 = vpack.c.bf16 %v65_v23, %v58_v21  ;;  %v73_v28 = vld [vmem:[#allocation5 + $0xf8] sm:$0xff]  ;;  %v80_v29 = vld [vmem:[#allocation5 + $0x130] sm:$0xff] }
  0x2d   :  { %505 = vmatprep.subr.bf16.mxu1 %v504_v18  ;;  %v492_v27 = vpack.c.bf16 %v78_v25, %v71_v24  ;;  %v70_v30 = vld [vmem:[#allocation5 + $0xe0] sm:$0xff]  ;;  %v508_v31 = vpack.c.bf16 %v80_v29, %v73_v28  ;;  %v77_v32 = vld [vmem:[#allocation5 + $0x118] sm:$0xff]  ;;  %v72_v33 = vld [vmem:[#allocation5 + $0xf0] sm:$0xff] }
  0x2e   :  { %v79_v34 = vld [vmem:[#allocation5 + $0x128] sm:$0xff]  ;;  %v494_v35 = vpack.c.bf16 %v77_v32, %v70_v30  ;;  %v85_v36 = vld [vmem:[#allocation5 + $0x158] sm:$0xff]  ;;  %v92_v37 = vld [vmem:[#allocation5 + $0x190] sm:$0xff] }
  0x2f   :  { %491 = vmatpush1.bf16.msra.mxu0 %v490_v22  ;;  %v87_v38 = vld [vmem:[#allocation5 + $0x168] sm:$0xff]  ;;  %507 = vmatpush1.bf16.msra.mxu1 %v506_v26  ;;  %v510_v39 = vpack.c.bf16 %v79_v34, %v72_v33  ;;  %v496_v40 = vpack.c.bf16 %v92_v37, %v85_v36  ;;  %v94_v41 = vld [vmem:[#allocation5 + $0x1a0] sm:$0xff]  ;;  %v84_v42 = vld [vmem:[#allocation5 + $0x150] sm:$0xff] }
  0x30   :  { %493 = vmatprep.subr.bf16.mxu0 %v492_v27  ;;  %v91_v43 = vld [vmem:[#allocation5 + $0x188] sm:$0xff]  ;;  %509 = vmatprep.subr.bf16.mxu1 %v508_v31  ;;  %v512_v44 = vpack.c.bf16 %v94_v41, %v87_v38  ;;  %v86_v45 = vld [vmem:[#allocation5 + $0x160] sm:$0xff]  ;;  %v93_v46 = vld [vmem:[#allocation5 + $0x198] sm:$0xff] }
  0x31   :  { %v47_v47 = vld [vmem:[#allocation5 + $0x28] sm:$0xff]  ;;  %v54_v48 = vld [vmem:[#allocation5 + $0x60] sm:$0xff]  ;;  %v498_v49 = vpack.c.bf16 %v91_v43, %v84_v42  ;;  %v514_v50 = vpack.c.bf16 %v93_v46, %v86_v45  ;;  %v53_v53 = vld [vmem:[#allocation5 + $0x58] sm:$0xff] }
  0x32   :  { %v516_v51 = vpack.c.bf16 %v54_v48, %v47_v47  ;;  %v46_v52 = vld [vmem:[#allocation5 + $0x20] sm:$0xff]  ;;  %v48_v54 = vld [vmem:[#allocation5 + $0x30] sm:$0xff]  ;;  %v55_v55 = vld [vmem:[#allocation5 + $0x68] sm:$0xff] }
  0x33   :  { %495 = vmatpush1.bf16.msra.mxu0 %v494_v35  ;;  %511 = vmatpush1.bf16.msra.mxu1 %v510_v39  ;;  %v61_v56 = vld [vmem:[#allocation5 + $0x98] sm:$0xff]  ;;  %v68_v57 = vld [vmem:[#allocation5 + $0xd0] sm:$0xff]  ;;  %v518_v59 = vpack.c.bf16 %v53_v53, %v46_v52  ;;  %v533_v60 = vpack.c.bf16 %v55_v55, %v48_v54  ;;  %v67_v63 = vld [vmem:[#allocation5 + $0xc8] sm:$0xff] }
  0x34   :  { %497 = vmatprep.subr.bf16.mxu0 %v496_v40  ;;  %513 = vmatprep.subr.bf16.mxu1 %v512_v44  ;;  %v41_v58 = vld [vmem:[#allocation2] sm:$0xff]  ;;  %v520_v61 = vpack.c.bf16 %v68_v57, %v61_v56  ;;  %v60_v62 = vld [vmem:[#allocation5 + $0x90] sm:$0xff]  ;;  %v62_v1 = vld [vmem:[#allocation5 + $0xa0] sm:$0xff] }
  0x35   :  { %v69_v3 = vld [vmem:[#allocation5 + $0xd8] sm:$0xff]  ;;  %v75_v4 = vld [vmem:[#allocation5 + $0x108] sm:$0xff]  ;;  %v82_v5 = vld [vmem:[#allocation5 + $0x140] sm:$0xff]  ;;  %v522_v6 = vpack.c.bf16 %v67_v63, %v60_v62 }
  0x36   :  { %v536_v7 = vpack.c.bf16 %v69_v3, %v62_v1  ;;  %v524_v8 = vpack.c.bf16 %v82_v5, %v75_v4  ;;  %v74_v9 = vld [vmem:[#allocation5 + $0x100] sm:$0xff]  ;;  %v81_v10 = vld [vmem:[#allocation5 + $0x138] sm:$0xff]  ;;  %v76_v11 = vld [vmem:[#allocation5 + $0x110] sm:$0xff] }
  0x37   :  { %499 = vmatpush1.bf16.msra.mxu0 %v498_v49  ;;  %515 = vmatpush1.bf16.msra.mxu1 %v514_v50  ;;  %v83_v12 = vld [vmem:[#allocation5 + $0x148] sm:$0xff]  ;;  %v89_v13 = vld [vmem:[#allocation5 + $0x178] sm:$0xff]  ;;  %v96_v14 = vld [vmem:[#allocation5 + $0x1b0] sm:$0xff]  ;;  %v526_v15 = vpack.c.bf16 %v81_v10, %v74_v9 }
  0x38   :  { %517 = vmatprep.subr.bf16.mxu0 %v516_v51  ;;  %532 = vmatprep.subr.bf16.mxu1 %v629_v2  ;;  %v539_v16 = vpack.c.bf16 %v83_v12, %v76_v11  ;;  %v528_v17 = vpack.c.bf16 %v96_v14, %v89_v13  ;;  %v88_v18 = vld [vmem:[#allocation5 + $0x170] sm:$0xff]  ;;  %v95_v19 = vld [vmem:[#allocation5 + $0x1a8] sm:$0xff]  ;;  %v90_v20 = vld [vmem:[#allocation5 + $0x180] sm:$0xff] }
  0x39   :  { %v97_v21 = vld [vmem:[#allocation5 + $0x1b8] sm:$0xff]  ;;  %v530_v22 = vpack.c.bf16 %v95_v19, %v88_v18 }
  0x3a   :  { %452 = vmatmul.mubr.msk.f32.vlgmr.msra.gmra.mrb[0].mxu0 %vm135_vm0, %v41_v58  ;;  %453 = vmatmul.mubr.msk.f32.vlgmr.msra.gmra.mrb[0].mxu1 %vm135_vm0, %v41_v58  ;;  %v542_v23 = vpack.c.bf16 %v97_v21, %v90_v20  ;;  %v98_v26 = vld [vmem:[%s708_s2] sm:$0xff]  ;;  %s631_s2 = smov [#allocation7]  }
  0x3b   :  { %519 = vmatpush1.bf16.msra.mxu0 %v518_v59  ;;  %534 = vmatpush3.bf16.msra.mxu1 %v533_v60  ;;  %s442_s11 = sshll.u32 %s631_s2, 4  ;;  %s443_s11 = int_to_ptr.vmem [resolvable:$true] %s442_s11 }
  0x3c   :  { %521 = vmatprep.subr.bf16.mxu0 %v520_v61  ;;  %535 = vmatprep.subr.bf16.mxu1 %v629_v2  ;;  %s596_s12 = scalar_lea.vmem %s443_s11, 896  ;;  %p601_p3 = scmp.lt.s32.totalorder %s443_s11, %s443_s11 }
  0x3d   :  { %345 = vmatprep.mubr.f32.mxu0 %v628_v0  ;;  %481 = vmatprep.mubr.msk.f32.mxu1 %vm630_vm1, %v628_v0  ;;  %v100_v0 = vlaneseq  ;;  %p597_p2 = scmp.ne.s32.totalorder %s443_s11, %s596_s12  ;;  %p602_p4 = scmp.lt.s32.totalorder %s596_s12, %s596_s12 }
  0x3f   :  { %523 = vmatpush1.bf16.msra.mxu0 %v522_v6  ;;  %537 = vmatpush3.bf16.msra.mxu1 %v536_v7  ;;  %v101_v24 = vshrl.u32 %v100_v0, 7  ;;  %p603_p5 = por %p602_p4, %p601_p3 }
  0x40   :  { %525 = vmatprep.subr.bf16.mxu0 %v524_v8  ;;  %538 = vmatprep.subr.bf16.mxu1 %v629_v2 }
  0x41   :  { %v102_v25 = vsub.s32 0, %v101_v24  ;;  %v106_v27 = vsub.s32 1, %v101_v24  ;;  %v110_v28 = vsub.s32 2, %v101_v24  ;;  %v114_v29 = vsub.s32 3, %v101_v24  ;;  %p604_p6 = pnand %p603_p5, %p597_p2 }
  0x42   :  { %v118_v46 = vsub.s32 4, %v101_v24  ;;  %v126_v47 = vsub.s32 6, %v101_v24  ;;  %v122_v48 = vsub.s32 5, %v101_v24 }
  0x43   :  { %527 = vmatpush1.bf16.msra.mxu0 %v526_v15  ;;  %540 = vmatpush3.bf16.msra.mxu1 %v539_v16  ;;  %v103_v30 = vrot.slane %v98_v26, %v102_v25  ;;  %v107_v31 = vrot.slane %v98_v26, %v106_v27  ;;  %v111_v32 = vrot.slane %v98_v26, %v110_v28 }
  0x44   :  { %529 = vmatprep.subr.bf16.mxu0 %v528_v17  ;;  %541 = vmatprep.subr.bf16.mxu1 %v629_v2  ;;  %v115_v33 = vrot.slane %v98_v26, %v114_v29  ;;  %v119_v49 = vrot.slane %v98_v26, %v118_v46  ;;  %v127_v50 = vrot.slane %v98_v26, %v126_v47 }
  0x45   :  { %v123_v51 = vrot.slane %v98_v26, %v122_v48 }
  0x47   :  { %531 = vmatpush1.bf16.msra.mxu0 %v530_v22  ;;  %543 = vmatpush3.bf16.msra.mxu1 %v542_v23 }
  0x4a   :  { %454 = vmatmul.mubr.msk.f32.vlgmr.msra.gmra.mrb[2].mxu0 %vm135_vm0, %v41_v58  ;;  %482 = vmatmul.mubr.msk.f32.vlgmr.msra.gmra.mrb[2].mxu1 %vm135_vm0, %v41_v58 }
 0x10d   :  { %v205_v34 = vpop.f32.mrb[0].mxu0  ;;  %v276_v37 = vpop.f32.mrb[0].mxu1 }
 0x10e   :  { %v206_v35 = vadd.f32 %v205_v34, %v103_v30  ;;  %v207_v36 = vpop.f32.mrb[1].mxu0  ;;  %v277_v39 = vadd.f32 %v276_v37, %v111_v32  ;;  %v278_v40 = vpop.f32.mrb[1].mxu1 }
 0x10f   :  { %v208_v38 = vadd.f32 %v207_v36, %v107_v31  ;;  %v279_v42 = vadd.f32 %v278_v40, %v115_v33 }
 0x110   :  { %v422_v41 = vmax.f32 %v206_v35, 0.0  ;;  %v424_v44 = vmax.f32 %v277_v39, 0.0 }
 0x111   :  { %v423_v43 = vmax.f32 %v208_v38, 0.0  ;;  %v425_v45 = vmax.f32 %v279_v42, 0.0 }
 0x112   :  { %429 = vst [vmem:[#allocation7] sm:$0xff] %v422_v41  ;;  %431 = vst [vmem:[#allocation7 + $0x10] sm:$0xff] %v424_v44 }
 0x113   :  { %430 = vst [vmem:[#allocation7 + $0x8] sm:$0xff] %v423_v43  ;;  %432 = vst [vmem:[#allocation7 + $0x18] sm:$0xff] %v425_v45 }
 0x11d   :  { %v347_v52 = vpop.f32.mrb[2].mxu0  ;;  %v418_v54 = vpop.f32.mrb[2].mxu1 }
 0x11e   :  { %v348_v53 = vadd.f32 %v347_v52, %v119_v49  ;;  %v349_v55 = vpop.f32.mrb[3].mxu0  ;;  %v419_v56 = vadd.f32 %v418_v54, %v127_v50  ;;  %v483_v58 = vpop.f32.mrb[3].mxu1 }
 0x11f   :  { %v350_v57 = vadd.f32 %v349_v55, %v123_v51 }
 0x120   :  { %v426_v59 = vmax.f32 %v348_v53, 0.0  ;;  %v428_v60 = vmax.f32 %v419_v56, 0.0 }
 0x121   :  { %v427_v61 = vmax.f32 %v350_v57, 0.0 }
 0x122   :  { %433 = vst [vmem:[#allocation7 + $0x20] sm:$0xff] %v426_v59  ;;  %435 = vst [vmem:[#allocation7 + $0x30] sm:$0xff] %v428_v60 }
 0x123   :  { %434 = vst [vmem:[#allocation7 + $0x28] sm:$0xff] %v427_v61 }
 0x124   :  { %607 = shalt.err (!%p604_p6)
}
 0x125   :  { %s608_s15 = scalar_lea.hbm %s709_s3, 896 }
 0x126   :  { %p609_p7 = scmp.ne.s32.totalorder %s709_s3, %s608_s15  ;;  %p612_p8 = scmp.lt.u32.totalorder %s608_s15, %s709_s3 }
 0x128   :  { %p614_p9 = pnand %p612_p8, %p609_p7 }
 0x12a   :  { %617 = shalt.err (!%p614_p9)
}
 0x12b   :  { %445 = dma.vmem_to_hbm [thread:$0]  %s443_s11, 896, %s709_s3, [#allocation4]  }
 0x12c   :  { %622 = dma.done.wait [#allocation4], 896  }
 0x12d   :  { %623 = vsyncadd [#allocation4], 4294966400 }
 0x12e   :  { %449 = vsyncpa [#allocation3], 1 }
 0x12f   :  { %450 = vsyncpa [#allocation6], 1 }
 0x130   :  { %451 = vsyncpa [#allocation4], 1 }

</bundles_post_ra>
